<compile_context>
chip_gen: v7x
topology: tpu7x:2x2x1
jax: 0.10.0
libtpu: 0.0.40
codegen_flags: <defaults>
</compile_context>

<pallas_src>
import functools

import jax
import jax.numpy as jnp
from jax import lax
from jax.experimental import pallas as pl
from jax.experimental.pallas import tpu as pltpu


def _norm_act(y, *, n_rows, act, valid_width=None):
    """BatchInitLinear first-run norm + activation, per-column stats over rows.

    out = (y - y.mean(axis=0)) / y.std(axis=0, unbiased); two-pass for precision.
    """
    mean = jnp.sum(y, axis=0, keepdims=True) * (1.0 / float(n_rows))
    c = y - mean
    var = jnp.sum(c * c, axis=0, keepdims=True) * (1.0 / float(n_rows - 1))
    if valid_width is not None and valid_width < y.shape[1]:
        # Columns >= valid_width are lane padding (zero weights): var == 0 there
        # would give 0 * inf = NaN.  Mask only those (discarded) columns.
        col = lax.broadcasted_iota(jnp.int32, (1, y.shape[1]), 1)
        var = jnp.where(col < valid_width, var, 1.0)
    out = c * lax.rsqrt(var)
    if act == "relu":
        return jnp.maximum(out, 0.0)
    # sigmoid(x) == 0.5 * tanh(0.5 * x) + 0.5   (tanh rides the EUP slot)
    return 0.5 * jnp.tanh(0.5 * out) + 0.5


def _grouped_norm_act(y, pool, *, n_rows, act):
    """Rand-function batch-init norm on the (B, V*F) block-diagonal layout.

    PyTorch computes stats over the (B*V, F) view, i.e. pooled over the batch
    AND the V voter column-groups of our layout.  pool[i, j] = 1 iff
    (i mod F) == (j mod F); one tiny MXU matmul pools the per-column sums across
    groups and broadcasts them back with zero cross-lane shuffles.
    """
    colsum = jnp.sum(y, axis=0, keepdims=True)                       # (1, V*F)
    mean = jnp.dot(colsum, pool,
                   preferred_element_type=jnp.float32) * (1.0 / float(n_rows))
    c = y - mean
    colsq = jnp.sum(c * c, axis=0, keepdims=True)                    # (1, V*F)
    var = jnp.dot(colsq, pool,
                  preferred_element_type=jnp.float32) * (1.0 / float(n_rows - 1))
    out = c * lax.rsqrt(var)
    if act == "relu":
        return jnp.maximum(out, 0.0)
    return 0.5 * jnp.tanh(0.5 * out) + 0.5


def _solution_model_kernel(*refs, rf_layers, cmp_layers, batch, voter_count,
                           out_valid):
    """Fused SolutionModel forward (first / batch-init pass)."""
    x_ref = refs[0]
    rf_w = refs[1:1 + rf_layers]
    rf_pool = refs[1 + rf_layers:1 + 2 * rf_layers]
    cmp_w = refs[1 + 2 * rf_layers:1 + 2 * rf_layers + cmp_layers]
    o_ref = refs[1 + 2 * rf_layers + cmp_layers]

    n_virtual = batch * voter_count   # rows of PyTorch's (B*V, .) view

    # ---- rand_function BaseModel, applied per voter via block-diagonal
    #      weights: ONE K = V*fan_in MXU push per layer instead of V pushes. ----
    h = x_ref[...]
    for l in range(rf_layers):
        y = jnp.dot(h, rf_w[l][...], preferred_element_type=jnp.float32)
        h = _grouped_norm_act(
            y, rf_pool[l][...], n_rows=n_virtual,
            act="sigmoid" if l == rf_layers - 1 else "relu")

    # ---- compare_model BaseModel: h is already in the concatenated
    #      (B, V*signal_count) layout, so layer 0 is one K = V*S matmul. ----
    last = cmp_layers - 1
    for l in range(cmp_layers):
        y = jnp.dot(h, cmp_w[l][...], preferred_element_type=jnp.float32)
        h = _norm_act(y, n_rows=batch,
                      act="sigmoid" if l == last else "relu",
                      valid_width=out_valid if l == last else None)

    o_ref[...] = h.astype(o_ref.dtype)


def init_solution_model_params(key, *, input_size, output_size, signal_count,
                               rand_function_hidden_size,
                               rand_function_layers_count,
                               compare_hidden_size, compare_layers_count,
                               voter_input=8, init_type="normal"):
    """BatchInitLinear weights, pre-transposed to (from, to) and pre-packed for
    the kernel: block-diagonal rand weights, group-pool matrices, lane-padded
    final layer.  Biases are nn.init.constant_(0.0) and cancel exactly in the
    batch-init normalization, so they are never materialized.  All of this is
    one-time weight prep (O(params)), not per-forward data movement.
    """
    voter_count = input_size // voter_input

    def sample_w(key, f, t):
        key, wk = jax.random.split(key)
        if init_type == "normal":
            w = jax.random.normal(wk, (t, f), dtype=jnp.float32)
        elif init_type == "uniform":
            w = jax.random.uniform(wk, (t, f), dtype=jnp.float32,
                                   minval=-1.0, maxval=1.0)
        else:
            raise ValueError("bad init_type")
        return key, w.T                                   # (from, to)

    # rand_function: voter_input -> hidden^(L-1) -> signal_count
    rf_sizes = ([voter_input]
                + [rand_function_hidden_size] * (rand_function_layers_count - 1)
                + [signal_count])
    eye_v = jnp.eye(voter_count, dtype=jnp.float32)
    rf_base, rf_bd, rf_pool = [], [], []
    for f, t in zip(rf_sizes, rf_sizes[1:]):
        key, w = sample_w(key, f, t)
        rf_base.append(w)
        rf_bd.append(jnp.kron(eye_v, w))                  # (V*f, V*t) block-diag
        idx = jnp.arange(voter_count * t) % t
        rf_pool.append((idx[:, None] == idx[None, :]).astype(jnp.float32))

    # compare_model: signal_count*V -> compare_hidden^(L-1) -> output_size
    cmp_sizes = ([signal_count * voter_count]
                 + [compare_hidden_size] * (compare_layers_count - 1)
                 + [output_size])
    cmp_base, cmp_ws = [], []
    for f, t in zip(cmp_sizes, cmp_sizes[1:]):
        key, w = sample_w(key, f, t)
        cmp_base.append(w)
        cmp_ws.append(w)
    # Lane-dense final store: pad the last layer's output width to >=128 lanes
    # with zero weight columns; real columns are sliced off after the kernel.
    out_pad = max(128, pl.cdiv(output_size, 128) * 128)
    cmp_ws[-1] = jnp.pad(cmp_ws[-1], ((0, 0), (0, out_pad - output_size)))

    return {"rf_bd": rf_bd, "rf_pool": rf_pool, "cmp": cmp_ws,
            "rf_base": rf_base, "cmp_base": cmp_base,
            "voter_count": voter_count, "voter_input": voter_input,
            "signal_count": signal_count, "output_size": output_size,
            "out_pad": out_pad}


def solution_model_forward(params, x):
    """SolutionModel.forward (first call / batch-init path), fully fused.

    No per-call preprocessing of x: it goes to the kernel exactly as provided.
    """
    rf_bd = list(params["rf_bd"])
    rf_pool = list(params["rf_pool"])
    cmp_ws = list(params["cmp"])
    voter_count = params["voter_count"]
    voter_input = params["voter_input"]
    output_size = params["output_size"]
    out_pad = params["out_pad"]

    batch = x.shape[0]
    assert x.shape[1] == voter_count * voter_input
    assert batch >= 2, "batch-init std (unbiased) needs at least 2 rows"

    inputs = [x] + rf_bd + rf_pool + cmp_ws
    kernel = functools.partial(
        _solution_model_kernel,
        rf_layers=len(rf_bd), cmp_layers=len(cmp_ws),
        batch=batch, voter_count=voter_count, out_valid=output_size)

    # Gridless whole-array call: every operand is a few KiB, far below VMEM.
    # TODO(synk): at production batch/width, add a ("parallel",) grid over the
    # compare-output features plus an "arbitrary" row-tile axis with cross-tile
    # sum/sumsq scratch for the batch-init norm, and re-derive tile sizes for
    # v7x's 64 MiB VMEM.
    padded = pl.pallas_call(
        kernel,
        out_shape=jax.ShapeDtypeStruct((batch, out_pad), jnp.float32),
        in_specs=[pl.BlockSpec(a.shape, lambda: (0, 0)) for a in inputs],
        out_specs=pl.BlockSpec((batch, out_pad), lambda: (0, 0)),
        compiler_params=pltpu.CompilerParams(vmem_limit_bytes=32 << 20),
    )(*inputs)
    return padded[:, :output_size]


def _reference_forward(params, x):
    """Pure-JAX replica of the PyTorch first-forward semantics (for checking)."""
    def base(ws, h):
        for i, w in enumerate(ws):
            y = h @ w
            mean = jnp.mean(y, axis=0)
            std = jnp.std(y, axis=0, ddof=1)
            out = (y - mean) / std
            h = jnp.maximum(out, 0.0) if i < len(ws) - 1 else jax.nn.sigmoid(out)
        return h

    b = x.shape[0]
    v, vi = params["voter_count"], params["voter_input"]
    h = x.reshape(b * v, vi)
    h = base(params["rf_base"], h)
    h = h.reshape(b, -1)
    return base(params["cmp_base"], h)


if __name__ == "__main__":
    # Small shapes consistent with SolutionModel (voter_input is fixed at 8).
    batch = 8
    voter_count = 4
    input_size = voter_count * 8            # 32
    output_size = 1
    signal_count = 8
    rand_function_hidden_size = 16
    rand_function_layers_count = 2
    compare_hidden_size = 32
    compare_layers_count = 3

    key = jax.random.PRNGKey(0)
    key, xk = jax.random.split(key)
    x = jax.random.normal(xk, (batch, input_size), dtype=jnp.float32)

    params = init_solution_model_params(
        key, input_size=input_size, output_size=output_size,
        signal_count=signal_count,
        rand_function_hidden_size=rand_function_hidden_size,
        rand_function_layers_count=rand_function_layers_count,
        compare_hidden_size=compare_hidden_size,
        compare_layers_count=compare_layers_count,
        init_type="normal")

    out = solution_model_forward(params, x)
    out = jax.block_until_ready(out)

    assert out.shape == (batch, output_size)
    assert bool(jnp.all(jnp.isfinite(out)))
    assert bool(jnp.all((out >= 0.0) & (out <= 1.0)))   # sigmoid output range

    ref = _reference_forward(params, x)
    assert bool(jnp.allclose(out, ref, rtol=1e-3, atol=1e-3)), (
        "kernel output deviates from pure-JAX reference")

    print("KERNEL_OK")
</pallas_src>

<mosaic_0001>
module attributes {stable_mosaic.version = 11 : i64} {
  func.func @_solution_model_kernel(%arg0: memref<8x32xf32, #tpu.memory_space<vmem>>, %arg1: memref<32x64xf32, #tpu.memory_space<vmem>>, %arg2: memref<64x32xf32, #tpu.memory_space<vmem>>, %arg3: memref<64x64xf32, #tpu.memory_space<vmem>>, %arg4: memref<32x32xf32, #tpu.memory_space<vmem>>, %arg5: memref<32x32xf32, #tpu.memory_space<vmem>>, %arg6: memref<32x32xf32, #tpu.memory_space<vmem>>, %arg7: memref<32x128xf32, #tpu.memory_space<vmem>>, %arg8: memref<8x128xf32, #tpu.memory_space<vmem>>) attributes {dimension_semantics = [], scalar_prefetch = 0 : i64, scratch_operands = 0 : i64, tpu.core_type = #tpu.core_type<tc>} {
    %c0 = arith.constant 0 : index
    %c0_0 = arith.constant 0 : index
    %0 = vector.load %arg0[%c0, %c0_0] : memref<8x32xf32, #tpu.memory_space<vmem>>, vector<8x32xf32>
    %c0_1 = arith.constant 0 : index
    %c0_2 = arith.constant 0 : index
    %1 = vector.load %arg1[%c0_1, %c0_2] : memref<32x64xf32, #tpu.memory_space<vmem>>, vector<32x64xf32>
    %cst = arith.constant dense<0.000000e+00> : vector<8x64xf32>
    %2 = tpu.matmul %0, %1, %cst {dimension_numbers = #tpu.dot_dimension_numbers<[1], [0], [0], [1], [0, 0, 1, 1], [], []>} : vector<8x32xf32>, vector<32x64xf32>, vector<8x64xf32> -> vector<8x64xf32>
    %c0_3 = arith.constant 0 : index
    %c0_4 = arith.constant 0 : index
    %3 = vector.load %arg3[%c0_3, %c0_4] : memref<64x64xf32, #tpu.memory_space<vmem>>, vector<64x64xf32>
    %cst_5 = arith.constant dense<0.000000e+00> : vector<64xf32>
    %4 = vector.multi_reduction <add>, %2, %cst_5 [0] : vector<8x64xf32> to vector<64xf32>
    %5 = vector.shape_cast %4 : vector<64xf32> to vector<1x64xf32>
    %cst_6 = arith.constant dense<0.000000e+00> : vector<1x64xf32>
    %6 = tpu.matmul %5, %3, %cst_6 {dimension_numbers = #tpu.dot_dimension_numbers<[1], [0], [0], [1], [0, 0, 1, 1], [], []>} : vector<1x64xf32>, vector<64x64xf32>, vector<1x64xf32> -> vector<1x64xf32>
    %cst_7 = arith.constant 3.125000e-02 : f32
    %7 = vector.broadcast %cst_7 : f32 to vector<1x64xf32>
    %8 = arith.mulf %6, %7 : vector<1x64xf32>
    %9 = vector.broadcast %8 : vector<1x64xf32> to vector<8x64xf32>
    %10 = arith.subf %2, %9 : vector<8x64xf32>
    %11 = arith.mulf %10, %10 : vector<8x64xf32>
    %cst_8 = arith.constant dense<0.000000e+00> : vector<64xf32>
    %12 = vector.multi_reduction <add>, %11, %cst_8 [0] : vector<8x64xf32> to vector<64xf32>
    %13 = vector.shape_cast %12 : vector<64xf32> to vector<1x64xf32>
    %cst_9 = arith.constant dense<0.000000e+00> : vector<1x64xf32>
    %14 = tpu.matmul %13, %3, %cst_9 {dimension_numbers = #tpu.dot_dimension_numbers<[1], [0], [0], [1], [0, 0, 1, 1], [], []>} : vector<1x64xf32>, vector<64x64xf32>, vector<1x64xf32> -> vector<1x64xf32>
    %cst_10 = arith.constant 0.0322580636 : f32
    %15 = vector.broadcast %cst_10 : f32 to vector<1x64xf32>
    %16 = arith.mulf %14, %15 : vector<1x64xf32>
    %17 = math.rsqrt %16 : vector<1x64xf32>
    %18 = vector.broadcast %17 : vector<1x64xf32> to vector<8x64xf32>
    %19 = arith.mulf %10, %18 : vector<8x64xf32>
    %cst_11 = arith.constant 0.000000e+00 : f32
    %20 = vector.broadcast %cst_11 : f32 to vector<8x64xf32>
    %21 = arith.maximumf %19, %20 : vector<8x64xf32>
    %c0_12 = arith.constant 0 : index
    %c0_13 = arith.constant 0 : index
    %22 = vector.load %arg2[%c0_12, %c0_13] : memref<64x32xf32, #tpu.memory_space<vmem>>, vector<64x32xf32>
    %cst_14 = arith.constant dense<0.000000e+00> : vector<8x32xf32>
    %23 = tpu.matmul %21, %22, %cst_14 {dimension_numbers = #tpu.dot_dimension_numbers<[1], [0], [0], [1], [0, 0, 1, 1], [], []>} : vector<8x64xf32>, vector<64x32xf32>, vector<8x32xf32> -> vector<8x32xf32>
    %c0_15 = arith.constant 0 : index
    %c0_16 = arith.constant 0 : index
    %24 = vector.load %arg4[%c0_15, %c0_16] : memref<32x32xf32, #tpu.memory_space<vmem>>, vector<32x32xf32>
    %cst_17 = arith.constant dense<0.000000e+00> : vector<32xf32>
    %25 = vector.multi_reduction <add>, %23, %cst_17 [0] : vector<8x32xf32> to vector<32xf32>
    %26 = vector.shape_cast %25 : vector<32xf32> to vector<1x32xf32>
    %cst_18 = arith.constant dense<0.000000e+00> : vector<1x32xf32>
    %27 = tpu.matmul %26, %24, %cst_18 {dimension_numbers = #tpu.dot_dimension_numbers<[1], [0], [0], [1], [0, 0, 1, 1], [], []>} : vector<1x32xf32>, vector<32x32xf32>, vector<1x32xf32> -> vector<1x32xf32>
    %cst_19 = arith.constant 3.125000e-02 : f32
    %28 = vector.broadcast %cst_19 : f32 to vector<1x32xf32>
    %29 = arith.mulf %27, %28 : vector<1x32xf32>
    %30 = vector.broadcast %29 : vector<1x32xf32> to vector<8x32xf32>
    %31 = arith.subf %23, %30 : vector<8x32xf32>
    %32 = arith.mulf %31, %31 : vector<8x32xf32>
    %cst_20 = arith.constant dense<0.000000e+00> : vector<32xf32>
    %33 = vector.multi_reduction <add>, %32, %cst_20 [0] : vector<8x32xf32> to vector<32xf32>
    %34 = vector.shape_cast %33 : vector<32xf32> to vector<1x32xf32>
    %cst_21 = arith.constant dense<0.000000e+00> : vector<1x32xf32>
    %35 = tpu.matmul %34, %24, %cst_21 {dimension_numbers = #tpu.dot_dimension_numbers<[1], [0], [0], [1], [0, 0, 1, 1], [], []>} : vector<1x32xf32>, vector<32x32xf32>, vector<1x32xf32> -> vector<1x32xf32>
    %cst_22 = arith.constant 0.0322580636 : f32
    %36 = vector.broadcast %cst_22 : f32 to vector<1x32xf32>
    %37 = arith.mulf %35, %36 : vector<1x32xf32>
    %38 = math.rsqrt %37 : vector<1x32xf32>
    %39 = vector.broadcast %38 : vector<1x32xf32> to vector<8x32xf32>
    %40 = arith.mulf %31, %39 : vector<8x32xf32>
    %cst_23 = arith.constant 5.000000e-01 : f32
    %41 = vector.broadcast %cst_23 : f32 to vector<8x32xf32>
    %42 = arith.mulf %41, %40 : vector<8x32xf32>
    %43 = math.tanh %42 : vector<8x32xf32>
    %cst_24 = arith.constant 5.000000e-01 : f32
    %44 = vector.broadcast %cst_24 : f32 to vector<8x32xf32>
    %45 = arith.mulf %44, %43 : vector<8x32xf32>
    %cst_25 = arith.constant 5.000000e-01 : f32
    %46 = vector.broadcast %cst_25 : f32 to vector<8x32xf32>
    %47 = arith.addf %45, %46 : vector<8x32xf32>
    %c0_26 = arith.constant 0 : index
    %c0_27 = arith.constant 0 : index
    %48 = vector.load %arg5[%c0_26, %c0_27] : memref<32x32xf32, #tpu.memory_space<vmem>>, vector<32x32xf32>
    %cst_28 = arith.constant dense<0.000000e+00> : vector<8x32xf32>
    %49 = tpu.matmul %47, %48, %cst_28 {dimension_numbers = #tpu.dot_dimension_numbers<[1], [0], [0], [1], [0, 0, 1, 1], [], []>} : vector<8x32xf32>, vector<32x32xf32>, vector<8x32xf32> -> vector<8x32xf32>
    %cst_29 = arith.constant dense<0.000000e+00> : vector<32xf32>
    %50 = vector.multi_reduction <add>, %49, %cst_29 [0] : vector<8x32xf32> to vector<32xf32>
    %51 = vector.shape_cast %50 : vector<32xf32> to vector<1x32xf32>
    %cst_30 = arith.constant 1.250000e-01 : f32
    %52 = vector.broadcast %cst_30 : f32 to vector<1x32xf32>
    %53 = arith.mulf %51, %52 : vector<1x32xf32>
    %54 = vector.broadcast %53 : vector<1x32xf32> to vector<8x32xf32>
    %55 = arith.subf %49, %54 : vector<8x32xf32>
    %56 = arith.mulf %55, %55 : vector<8x32xf32>
    %cst_31 = arith.constant dense<0.000000e+00> : vector<32xf32>
    %57 = vector.multi_reduction <add>, %56, %cst_31 [0] : vector<8x32xf32> to vector<32xf32>
    %58 = vector.shape_cast %57 : vector<32xf32> to vector<1x32xf32>
    %cst_32 = arith.constant 0.142857149 : f32
    %59 = vector.broadcast %cst_32 : f32 to vector<1x32xf32>
    %60 = arith.mulf %58, %59 : vector<1x32xf32>
    %61 = math.rsqrt %60 : vector<1x32xf32>
    %62 = vector.broadcast %61 : vector<1x32xf32> to vector<8x32xf32>
    %63 = arith.mulf %55, %62 : vector<8x32xf32>
    %cst_33 = arith.constant 0.000000e+00 : f32
    %64 = vector.broadcast %cst_33 : f32 to vector<8x32xf32>
    %65 = arith.maximumf %63, %64 : vector<8x32xf32>
    %c0_34 = arith.constant 0 : index
    %c0_35 = arith.constant 0 : index
    %66 = vector.load %arg6[%c0_34, %c0_35] : memref<32x32xf32, #tpu.memory_space<vmem>>, vector<32x32xf32>
    %cst_36 = arith.constant dense<0.000000e+00> : vector<8x32xf32>
    %67 = tpu.matmul %65, %66, %cst_36 {dimension_numbers = #tpu.dot_dimension_numbers<[1], [0], [0], [1], [0, 0, 1, 1], [], []>} : vector<8x32xf32>, vector<32x32xf32>, vector<8x32xf32> -> vector<8x32xf32>
    %cst_37 = arith.constant dense<0.000000e+00> : vector<32xf32>
    %68 = vector.multi_reduction <add>, %67, %cst_37 [0] : vector<8x32xf32> to vector<32xf32>
    %69 = vector.shape_cast %68 : vector<32xf32> to vector<1x32xf32>
    %cst_38 = arith.constant 1.250000e-01 : f32
    %70 = vector.broadcast %cst_38 : f32 to vector<1x32xf32>
    %71 = arith.mulf %69, %70 : vector<1x32xf32>
    %72 = vector.broadcast %71 : vector<1x32xf32> to vector<8x32xf32>
    %73 = arith.subf %67, %72 : vector<8x32xf32>
    %74 = arith.mulf %73, %73 : vector<8x32xf32>
    %cst_39 = arith.constant dense<0.000000e+00> : vector<32xf32>
    %75 = vector.multi_reduction <add>, %74, %cst_39 [0] : vector<8x32xf32> to vector<32xf32>
    %76 = vector.shape_cast %75 : vector<32xf32> to vector<1x32xf32>
    %cst_40 = arith.constant 0.142857149 : f32
    %77 = vector.broadcast %cst_40 : f32 to vector<1x32xf32>
    %78 = arith.mulf %76, %77 : vector<1x32xf32>
    %79 = math.rsqrt %78 : vector<1x32xf32>
    %80 = vector.broadcast %79 : vector<1x32xf32> to vector<8x32xf32>
    %81 = arith.mulf %73, %80 : vector<8x32xf32>
    %cst_41 = arith.constant 0.000000e+00 : f32
    %82 = vector.broadcast %cst_41 : f32 to vector<8x32xf32>
    %83 = arith.maximumf %81, %82 : vector<8x32xf32>
    %c0_42 = arith.constant 0 : index
    %c0_43 = arith.constant 0 : index
    %84 = vector.load %arg7[%c0_42, %c0_43] : memref<32x128xf32, #tpu.memory_space<vmem>>, vector<32x128xf32>
    %cst_44 = arith.constant dense<0.000000e+00> : vector<8x128xf32>
    %85 = tpu.matmul %83, %84, %cst_44 {dimension_numbers = #tpu.dot_dimension_numbers<[1], [0], [0], [1], [0, 0, 1, 1], [], []>} : vector<8x32xf32>, vector<32x128xf32>, vector<8x128xf32> -> vector<8x128xf32>
    %cst_45 = arith.constant dense<0.000000e+00> : vector<128xf32>
    %86 = vector.multi_reduction <add>, %85, %cst_45 [0] : vector<8x128xf32> to vector<128xf32>
    %87 = vector.shape_cast %86 : vector<128xf32> to vector<1x128xf32>
    %cst_46 = arith.constant 1.250000e-01 : f32
    %88 = vector.broadcast %cst_46 : f32 to vector<1x128xf32>
    %89 = arith.mulf %87, %88 : vector<1x128xf32>
    %90 = vector.broadcast %89 : vector<1x128xf32> to vector<8x128xf32>
    %91 = arith.subf %85, %90 : vector<8x128xf32>
    %92 = arith.mulf %91, %91 : vector<8x128xf32>
    %cst_47 = arith.constant dense<0.000000e+00> : vector<128xf32>
    %93 = vector.multi_reduction <add>, %92, %cst_47 [0] : vector<8x128xf32> to vector<128xf32>
    %94 = vector.shape_cast %93 : vector<128xf32> to vector<1x128xf32>
    %cst_48 = arith.constant 0.142857149 : f32
    %95 = vector.broadcast %cst_48 : f32 to vector<1x128xf32>
    %96 = arith.mulf %94, %95 : vector<1x128xf32>
    %97 = tpu.iota {dimensions = array<i32: 1>} : vector<1x128xi32>
    %c1_i32 = arith.constant 1 : i32
    %98 = vector.broadcast %c1_i32 : i32 to vector<1x128xi32>
    %99 = arith.cmpi slt, %97, %98 : vector<1x128xi32>
    %cst_49 = arith.constant 1.000000e+00 : f32
    %100 = vector.broadcast %cst_49 : f32 to vector<1x128xf32>
    %101 = arith.select %99, %96, %100 : vector<1x128xi1>, vector<1x128xf32>
    %102 = math.rsqrt %101 : vector<1x128xf32>
    %103 = vector.broadcast %102 : vector<1x128xf32> to vector<8x128xf32>
    %104 = arith.mulf %91, %103 : vector<8x128xf32>
    %cst_50 = arith.constant 5.000000e-01 : f32
    %105 = vector.broadcast %cst_50 : f32 to vector<8x128xf32>
    %106 = arith.mulf %105, %104 : vector<8x128xf32>
    %107 = math.tanh %106 : vector<8x128xf32>
    %cst_51 = arith.constant 5.000000e-01 : f32
    %108 = vector.broadcast %cst_51 : f32 to vector<8x128xf32>
    %109 = arith.mulf %108, %107 : vector<8x128xf32>
    %cst_52 = arith.constant 5.000000e-01 : f32
    %110 = vector.broadcast %cst_52 : f32 to vector<8x128xf32>
    %111 = arith.addf %109, %110 : vector<8x128xf32>
    %c0_53 = arith.constant 0 : index
    %c0_54 = arith.constant 0 : index
    %112 = vector.load %arg8[%c0_53, %c0_54] : memref<8x128xf32, #tpu.memory_space<vmem>>, vector<8x128xf32>
    tpu.vector_store %arg8[%c0_53, %c0_54], %111 {strides = array<i32>} : memref<8x128xf32, #tpu.memory_space<vmem>>, vector<8x128xf32>,
    return
  }
}

</mosaic_0001>

<bundles_post_ra>
// kernel: tpu_custom_call.1
= control target key start
LH: loop header
LB: loop body
LE: loop exit
PB: predicated region body
PF: predicated region fallthrough
CT: control target
= control target key end

     0   :  { %13 = vsyncpa [#allocation3], 0  ;;  %s1602_s0 = inlined_call_operand.vmem [shape: f32[8,32], index: 0, kind: input, shape index: {}]   ;;  %s1603_s1 = inlined_call_operand.vmem [shape: f32[32,64], index: 1, kind: input, shape index: {}]   ;;  %s1604_s2 = inlined_call_operand.vmem [shape: f32[64,32], index: 2, kind: input, shape index: {}]   ;;  %s1605_s3 = inlined_call_operand.vmem [shape: f32[64,64], index: 3, kind: input, shape index: {}]   ;;  %s1606_s4 = inlined_call_operand.hbm [shape: f32[32,32], index: 4, kind: input, shape index: {}]   ;;  %s1607_s5 = inlined_call_operand.hbm [shape: f32[32,32], index: 5, kind: input, shape index: {}]   ;;  %s1608_s6 = inlined_call_operand.hbm [shape: f32[32,32], index: 6, kind: input, shape index: {}]   ;;  %s1609_s7 = inlined_call_operand.hbm [shape: f32[32,128], index: 7, kind: input, shape index: {}]   ;;  %s1610_s8 = inlined_call_operand.hbm [shape: f32[8,128], index: 8, kind: output, shape index: {}]  }
   0x1   :  { %14 = vsyncpa [#allocation6], 0 }
   0x2   :  { %15 = vsyncpa [#allocation9], 0 }
   0x3   :  { %16 = vsyncpa [#allocation4], 0  ;;  %s1331_s27 = smov [#allocation5]   ;;  %s1332_s29 = smov [#allocation2]  }
   0x4   :  { %s42_s28 = sshll.u32 %s1331_s27, 4  ;;  %s30_s30 = sshll.u32 %s1332_s29, 4  ;;  %s43_s28 = int_to_ptr.vmem [resolvable:$true] %s42_s28  ;;  %s1386_s30 = int_to_ptr.vmem [resolvable:$true] %s30_s30 }
   0x5   :  { %s1213_s11 = scalar_lea.hbm %s1607_s5, 512 }
   0x6   :  { %p1214_p0 = scmp.ne.s32.totalorder %s1607_s5, %s1213_s11  ;;  %p1217_p1 = scmp.lt.u32.totalorder %s1213_s11, %s1607_s5 }
   0x8   :  { %p1219_p2 = pnand %p1217_p1, %p1214_p0 }
   0xa   :  { %1222 = shalt.err (!%p1219_p2)
}
   0xb   :  { %s1223_s16 = scalar_lea.vmem %s43_s28, 512  ;;  %p1228_p4 = scmp.lt.s32.totalorder %s43_s28, %s43_s28 }
   0xc   :  { %p1224_p3 = scmp.ne.s32.totalorder %s43_s28, %s1223_s16  ;;  %p1229_p5 = scmp.lt.s32.totalorder %s1223_s16, %s1223_s16 }
   0xe   :  { %p1230_p6 = por %p1229_p5, %p1228_p4 }
  0x10   :  { %p1231_p7 = pnand %p1230_p6, %p1224_p3 }
  0x12   :  { %1234 = shalt.err (!%p1231_p7)
}
  0x13   :  { %s1333_s17 = smov 128   ;;  %s1334_s18 = smov 8  }
  0x14   :  { %48 = dma.hbm_to_vmem [thread:$0]  %s1607_s5, 512, %s43_s28, [#allocation6], %s1333_s17, %s1333_s17, %s1334_s18  }
  0x15   :  { %s1235_s23 = scalar_lea.hbm %s1606_s4, 512 }
  0x16   :  { %p1236_p8 = scmp.ne.s32.totalorder %s1606_s4, %s1235_s23  ;;  %p1239_p9 = scmp.lt.u32.totalorder %s1235_s23, %s1606_s4 }
  0x18   :  { %p1241_p10 = pnand %p1239_p9, %p1236_p8 }
  0x1a   :  { %1244 = shalt.err (!%p1241_p10)
}
  0x1b   :  { %s1245_s29 = scalar_lea.vmem %s1386_s30, 512  ;;  %p1250_p12 = scmp.lt.s32.totalorder %s1386_s30, %s1386_s30 }
  0x1c   :  { %p1246_p11 = scmp.ne.s32.totalorder %s1386_s30, %s1245_s29  ;;  %p1251_p13 = scmp.lt.s32.totalorder %s1245_s29, %s1245_s29 }
  0x1e   :  { %p1252_p0 = por %p1251_p13, %p1250_p12 }
  0x20   :  { %p1253_p1 = pnand %p1252_p0, %p1246_p11 }
  0x22   :  { %1256 = shalt.err (!%p1253_p1)
}
  0x23   :  { %36 = dma.hbm_to_vmem [thread:$0]  %s1606_s4, 512, %s1386_s30, [#allocation3], %s1333_s17, %s1333_s17, %s1334_s18  }
  0x24   :  { %s1335_s9 = smov [#allocation7]   ;;  %s1336_s11 = smov [#allocation8]  }
  0x25   :  { %s54_s10 = sshll.u32 %s1335_s9, 4  ;;  %s66_s12 = sshll.u32 %s1336_s11, 4  ;;  %s55_s10 = int_to_ptr.vmem [resolvable:$true] %s54_s10  ;;  %s1423_s12 = int_to_ptr.vmem [resolvable:$true] %s66_s12 }
  0x26   :  { %s1257_s15 = scalar_lea.hbm %s1608_s6, 512 }
  0x27   :  { %p1258_p2 = scmp.ne.s32.totalorder %s1608_s6, %s1257_s15  ;;  %p1261_p3 = scmp.lt.u32.totalorder %s1257_s15, %s1608_s6 }
  0x29   :  { %p1263_p4 = pnand %p1261_p3, %p1258_p2 }
  0x2b   :  { %1266 = shalt.err (!%p1263_p4)
}
  0x2c   :  { %s1267_s4 = scalar_lea.vmem %s55_s10, 512  ;;  %p1272_p6 = scmp.lt.s32.totalorder %s55_s10, %s55_s10 }
  0x2d   :  { %p1268_p5 = scmp.ne.s32.totalorder %s55_s10, %s1267_s4  ;;  %p1273_p7 = scmp.lt.s32.totalorder %s1267_s4, %s1267_s4 }
  0x2f   :  { %p1274_p8 = por %p1273_p7, %p1272_p6 }
  0x31   :  { %p1275_p9 = pnand %p1274_p8, %p1268_p5 }
  0x33   :  { %1278 = shalt.err (!%p1275_p9)
}
  0x34   :  { %60 = dma.hbm_to_vmem [thread:$0]  %s1608_s6, 512, %s55_s10, [#allocation6], %s1333_s17, %s1333_s17, %s1334_s18  }
  0x35   :  { %s1279_s25 = scalar_lea.hbm %s1609_s7, 512 }
  0x36   :  { %p1280_p10 = scmp.ne.s32.totalorder %s1609_s7, %s1279_s25  ;;  %p1283_p11 = scmp.lt.u32.totalorder %s1279_s25, %s1609_s7 }
  0x38   :  { %p1285_p12 = pnand %p1283_p11, %p1280_p10 }
  0x3a   :  { %1288 = shalt.err (!%p1285_p12)
}
  0x3b   :  { %s1289_s28 = scalar_lea.vmem %s1423_s12, 512  ;;  %p1294_p0 = scmp.lt.s32.totalorder %s1423_s12, %s1423_s12 }
  0x3c   :  { %p1290_p13 = scmp.ne.s32.totalorder %s1423_s12, %s1289_s28  ;;  %p1295_p1 = scmp.lt.s32.totalorder %s1289_s28, %s1289_s28 }
  0x3e   :  { %p1296_p2 = por %p1295_p1, %p1294_p0 }
  0x40   :  { %p1297_p3 = pnand %p1296_p2, %p1290_p13 }
  0x42   :  { %1300 = shalt.err (!%p1297_p3)
}
  0x43   :  { %72 = dma.hbm_to_vmem [thread:$0]  %s1609_s7, 512, %s1423_s12, [#allocation9], %s1333_s17, %s1333_s17, %s1334_s18  }
  0x44   :  { %1323 = dma.done.wait [#allocation3], 512  }
  0x45   :  { %1324 = vsyncadd [#allocation3], 4294966784 }
  0x46   :  { %1325 = dma.done.wait [#allocation6], 1024  }
  0x47   :  { %1326 = vsyncadd [#allocation6], 4294966272 }
  0x48   :  { %1327 = dma.done.wait [#allocation9], 512  }
  0x49   :  { %1328 = vsyncadd [#allocation9], 4294966784  ;;  %v1337_v0 = vmov 0.0|0.0   ;;  %vm1338_vm0 = vmmov 0   ;;  %v1339_v1 = vmov 0.0   ;;  %v86_v2 = vld [vmem:[%s1603_s1] sm:$0xff]  ;;  %v254_v30 = vlaneseq }
  0x4a   :  { %1117 = vmatprep.subr.bf16.mxu0 %v1337_v0  ;;  %1002 = vmatprep.mubr.msk.f32.mxu0 %vm1338_vm0, %v1339_v1  ;;  %v87_v3 = vld [vmem:[%s1603_s1 + $0x8] sm:$0xff]  ;;  %v88_v4 = vld [vmem:[%s1603_s1 + $0x10] sm:$0xff]  ;;  %v89_v6 = vld [vmem:[%s1603_s1 + $0x18] sm:$0xff]  ;;  %vm90_vm1 = vcmask 261120   ;;  %vm172_vm2 = vcmask 523264  }
  0x4b   :  { %1123 = vmatprep.subr.bf16.mxu1 %v1337_v0  ;;  %1021 = vmatprep.mubr.msk.f32.mxu1 %vm1338_vm0, %v1339_v1  ;;  %v1118_v5 = vpack.c.bf16 %v87_v3, %v86_v2  ;;  %v164_v7 = vld [vmem:[%s1605_s3] sm:$0xff]  ;;  %v165_v8 = vld [vmem:[%s1605_s3 + $0x8] sm:$0xff]  ;;  %v1121_v9 = vpack.c.bf16 %v89_v6, %v88_v4  ;;  %v166_v12 = vld [vmem:[%s1605_s3 + $0x10] sm:$0xff]  ;;  %v255_v31 = vshrl.u32 %v254_v30, 7 }
  0x4c   :  { %v1124_v10 = vpack.c.bf16 %v165_v8, %v164_v7  ;;  %v85_v11 = vld [vmem:[%s1602_s0] sm:$0xff]  ;;  %v167_v13 = vld [vmem:[%s1605_s3 + $0x18] sm:$0xff]  ;;  %v169_v16 = vld [vmem:[%s1605_s3 + $0x28] sm:$0xff] }
  0x4d   :  { %1119 = vmatpush3.bf16.msra.mxu0 %v1118_v5  ;;  %v1127_v14 = vpack.c.bf16 %v167_v13, %v166_v12  ;;  %v168_v15 = vld [vmem:[%s1605_s3 + $0x20] sm:$0xff]  ;;  %v170_v18 = vld [vmem:[%s1605_s3 + $0x30] sm:$0xff]  ;;  %v171_v19 = vld [vmem:[%s1605_s3 + $0x38] sm:$0xff]  ;;  %v1523_v32 = vsub.s32 0, %v255_v31 }
  0x4e   :  { %1120 = vmatprep.subr.bf16.mxu0 %v1337_v0  ;;  %1125 = vmatpush3.bf16.msra.mxu1 %v1124_v10  ;;  %v1130_v17 = vpack.c.bf16 %v169_v16, %v168_v15  ;;  %v1133_v20 = vpack.c.bf16 %v171_v19, %v170_v18  ;;  %v348_v46 = vld [vmem:[%s1604_s2] sm:$0xff]  ;;  %v349_v47 = vld [vmem:[%s1604_s2 + $0x8] sm:$0xff]  ;;  %v350_v49 = vld [vmem:[%s1604_s2 + $0x10] sm:$0xff] }
  0x4f   :  { %1126 = vmatprep.subr.bf16.mxu1 %v1337_v0  ;;  %v1148_v48 = vpack.c.bf16 %v349_v47, %v348_v46  ;;  %v351_v50 = vld [vmem:[%s1604_s2 + $0x18] sm:$0xff]  ;;  %v352_v52 = vld [vmem:[%s1604_s2 + $0x20] sm:$0xff]  ;;  %v353_v53 = vld [vmem:[%s1604_s2 + $0x28] sm:$0xff] }
  0x50   :  { %v1151_v51 = vpack.c.bf16 %v351_v50, %v350_v49  ;;  %v1154_v54 = vpack.c.bf16 %v353_v53, %v352_v52  ;;  %v354_v55 = vld [vmem:[%s1604_s2 + $0x30] sm:$0xff]  ;;  %v355_v56 = vld [vmem:[%s1604_s2 + $0x38] sm:$0xff]  ;;  %v429_v3 = vld [vmem:[#allocation2] sm:$0xff]  ;;  %s1340_s2 = smov [#allocation10]  }
  0x51   :  { %1122 = vmatpush3.bf16.msra.mxu0 %v1121_v9  ;;  %v1157_v57 = vpack.c.bf16 %v355_v56, %v354_v55  ;;  %v430_v4 = vld [vmem:[#allocation2 + $0x8] sm:$0xff]  ;;  %v431_v6 = vld [vmem:[#allocation2 + $0x10] sm:$0xff]  ;;  %v432_v7 = vld [vmem:[#allocation2 + $0x18] sm:$0xff]  ;;  %s917_s4 = sshll.u32 %s1340_s2, 4  ;;  %s918_s4 = int_to_ptr.vmem [resolvable:$true] %s917_s4 }
  0x52   :  { %1135 = vmatprep.subr.bf16.mxu0 %v1337_v0  ;;  %1128 = vmatpush3.bf16.msra.mxu1 %v1127_v14  ;;  %v1160_v5 = vpack.c.bf16 %v430_v4, %v429_v3  ;;  %v1163_v8 = vpack.c.bf16 %v432_v7, %v431_v6  ;;  %v709_v49 = vld [vmem:[#allocation7] sm:$0xff]  ;;  %v710_v50 = vld [vmem:[#allocation7 + $0x8] sm:$0xff]  ;;  %v711_v52 = vld [vmem:[#allocation7 + $0x10] sm:$0xff]  ;;  %s1301_s1 = scalar_lea.vmem %s918_s4, 128  ;;  %p1306_p5 = scmp.lt.s32.totalorder %s918_s4, %s918_s4 }
  0x53   :  { %1129 = vmatprep.subr.bf16.mxu1 %v1337_v0  ;;  %v712_v53 = vld [vmem:[#allocation7 + $0x18] sm:$0xff]  ;;  %p1302_p4 = scmp.ne.s32.totalorder %s918_s4, %s1301_s1  ;;  %p1307_p6 = scmp.lt.s32.totalorder %s1301_s1, %s1301_s1 }
  0x54   :  { %1003 = vmatmul.mubr.msk.f32.vlgmr.msra.gmra.mrb[0].mxu0 %vm90_vm1, %v85_v11 }
  0x55   :  { %1137 = vmatpush3.bf16.msra.mxu0 %v1124_v10  ;;  %1040 = vmatprep.mubr.msk.f32.mxu0 %vm1338_vm0, %v1339_v1  ;;  %p1308_p7 = por %p1307_p6, %p1306_p5 }
  0x56   :  { %1138 = vmatprep.subr.bf16.mxu0 %v1337_v0  ;;  %1131 = vmatpush3.bf16.msra.mxu1 %v1130_v17 }
  0x57   :  { %1132 = vmatprep.subr.bf16.mxu1 %v1337_v0  ;;  %p1309_p8 = pnand %p1308_p7, %p1302_p4 }
  0x59   :  { %1140 = vmatpush3.bf16.msra.mxu0 %v1127_v14 }
  0x5a   :  { %1141 = vmatprep.subr.bf16.mxu0 %v1337_v0  ;;  %1134 = vmatpush3.bf16.msra.mxu1 %v1133_v20 }
  0x5b   :  { %1147 = vmatprep.subr.bf16.mxu1 %v1337_v0 }
  0x5d   :  { %1143 = vmatpush3.bf16.msra.mxu0 %v1130_v17 }
  0x5e   :  { %1144 = vmatprep.subr.bf16.mxu0 %v1337_v0 }
  0x61   :  { %1146 = vmatpush3.bf16.msra.mxu0 %v1133_v20 }
  0x62   :  { %1159 = vmatprep.subr.bf16.mxu0 %v1337_v0 }
 0x127   :  { %v160_v21 = vpop.f32.mrb[0].mxu0 }
 0x128   :  { %v173_v22 = vsel %vm172_vm2, %v160_v21, 0.0  ;;  %v1004_v23 = vpop.f32.mrb[1].mxu0 }
 0x129   :  { %v174_v24 = vrot.slane %v173_v22, 4 }
 0x12b   :  { %v175_v25 = vadd.f32 %v174_v24, %v173_v22 }
 0x12d   :  { %v176_v26 = vrot.slane %v175_v25, 2 }
 0x12f   :  { %v177_v27 = vadd.f32 %v176_v26, %v175_v25 }
 0x131   :  { %v178_v28 = vrot.slane %v177_v27, 1 }
 0x133   :  { %v179_v29 = vadd.f32 %v178_v28, %v177_v27 }
 0x135   :  { %1022 = vmatmul.mubr.msk.f32.vlgmr.msra.gmra.mrb[0].mxu1 %vm172_vm2, %v179_v29 }
 0x136   :  { %1059 = vmatprep.mubr.msk.f32.mxu1 %vm1338_vm0, %v1339_v1  ;;  %1149 = vmatpush3.bf16.msra.mxu1 %v1148_v48 }
 0x137   :  { %1150 = vmatprep.subr.bf16.mxu1 %v1337_v0 }
 0x13a   :  { %1152 = vmatpush3.bf16.msra.mxu1 %v1151_v51  ;;  %v1178_v51 = vpack.c.bf16 %v710_v50, %v709_v49 }
 0x13b   :  { %1153 = vmatprep.subr.bf16.mxu1 %v1337_v0 }
 0x13e   :  { %1155 = vmatpush3.bf16.msra.mxu1 %v1154_v54 }
 0x13f   :  { %1156 = vmatprep.subr.bf16.mxu1 %v1337_v0 }
 0x142   :  { %1158 = vmatpush3.bf16.msra.mxu1 %v1157_v57 }
 0x143   :  { %1171 = vmatprep.subr.bf16.mxu1 %v1337_v0 }
 0x208   :  { %v249_v33 = vpop.f32.mrb[0].mxu1 }
 0x209   :  { %v253_v34 = vmul.f32 0.03125, %v249_v33  ;;  %v1023_v35 = vpop.f32.mrb[1].mxu1  ;;  %v611_v33 = vld [vmem:[#allocation5] sm:$0xff] }
 0x20a   :  { %v613_v35 = vld [vmem:[#allocation5 + $0x10] sm:$0xff] }
 0x20b   :  { %v257_v36 = vrot.slane %v253_v34, %v1523_v32  ;;  %v612_v34 = vld [vmem:[#allocation5 + $0x8] sm:$0xff] }
 0x20d   :  { %v258_v37 = vsub.f32 %v160_v21, %v257_v36  ;;  %v1172_v36 = vpack.c.bf16 %v612_v34, %v611_v33 }
 0x20f   :  { %v259_v38 = vmul.f32 %v258_v37, %v258_v37 }
 0x211   :  { %v260_v39 = vsel %vm172_vm2, %v259_v38, 0.0 }
 0x212   :  { %v261_v40 = vrot.slane %v260_v39, 4 }
 0x214   :  { %v262_v41 = vadd.f32 %v261_v40, %v260_v39 }
 0x216   :  { %v263_v42 = vrot.slane %v262_v41, 2 }
 0x218   :  { %v264_v43 = vadd.f32 %v263_v42, %v262_v41 }
 0x21a   :  { %v265_v44 = vrot.slane %v264_v43, 1 }
 0x21c   :  { %v266_v45 = vadd.f32 %v265_v44, %v264_v43 }
 0x21e   :  { %1041 = vmatmul.mubr.msk.f32.vlgmr.msra.gmra.mrb[2].mxu0 %vm172_vm2, %v266_v45 }
 0x21f   :  { %1070 = vmatprep.mubr.msk.f32.mxu0 %vm1338_vm0, %v1339_v1  ;;  %1161 = vmatpush3.bf16.msra.mxu0 %v1160_v5 }
 0x220   :  { %1162 = vmatprep.subr.bf16.mxu0 %v1337_v0 }
 0x223   :  { %1164 = vmatpush3.bf16.msra.mxu0 %v1163_v8 }
 0x224   :  { %1165 = vmatprep.subr.bf16.mxu0 %v1337_v0 }
 0x2f1   :  { %v336_v58 = vpop.f32.mrb[2].mxu0 }
 0x2f2   :  { %v340_v59 = vmul.f32 0.032258064, %v336_v58  ;;  %v1042_v60 = vpop.f32.mrb[3].mxu0 }
 0x2f4   :  { %1199 = vrsqrt.f32 %v340_v59 }
 0x2fe   :  { %v1200_v61 = vpop.eup %1199 }
 0x2ff   :  { %v345_v62 = vrot.slane %v1200_v61, %v1523_v32 }
 0x301   :  { %v346_v63 = vmul.f32 %v345_v62, %v258_v37  ;;  %v614_v37 = vld [vmem:[#allocation5 + $0x18] sm:$0xff] }
 0x302   :  { %v1175_v38 = vpack.c.bf16 %v614_v37, %v613_v35 }
 0x303   :  { %v347_v2 = vmax.f32 %v346_v63, 0.0 }
 0x305   :  { %1060 = vmatmul.mubr.msk.f32.vlgmr.msra.gmra.mrb[2].mxu1 %vm172_vm2, %v347_v2 }
 0x306   :  { %1092 = vmatprep.mubr.msk.f32.mxu1 %vm1338_vm0, %v1339_v1  ;;  %1173 = vmatpush3.bf16.msra.mxu1 %v1172_v36 }
 0x307   :  { %1174 = vmatprep.subr.bf16.mxu1 %v1337_v0 }
 0x30a   :  { %1176 = vmatpush3.bf16.msra.mxu1 %v1175_v38 }
 0x30b   :  { %1183 = vmatprep.subr.bf16.mxu1 %v1337_v0 }
 0x3d8   :  { %v425_v9 = vpop.f32.mrb[2].mxu1 }
 0x3d9   :  { %v433_v10 = vsel %vm90_vm1, %v425_v9, 0.0  ;;  %v1061_v11 = vpop.f32.mrb[3].mxu1 }
 0x3da   :  { %v434_v12 = vrot.slane %v433_v10, 4 }
 0x3dc   :  { %v435_v13 = vadd.f32 %v434_v12, %v433_v10 }
 0x3de   :  { %v436_v14 = vrot.slane %v435_v13, 2 }
 0x3e0   :  { %v437_v15 = vadd.f32 %v436_v14, %v435_v13  ;;  %v807_v14 = vld [vmem:[#allocation8] sm:$0xff] }
 0x3e2   :  { %v438_v16 = vrot.slane %v437_v15, 1 }
 0x3e4   :  { %v439_v17 = vadd.f32 %v438_v16, %v437_v15  ;;  %v808_v15 = vld [vmem:[#allocation8 + $0x8] sm:$0xff] }
 0x3e5   :  { %v1184_v16 = vpack.c.bf16 %v808_v15, %v807_v14 }
 0x3e6   :  { %1071 = vmatmul.mubr.msk.f32.vlgmr.msra.gmra.mrb[4].mxu0 %vm90_vm1, %v439_v17  ;;  %v809_v17 = vld [vmem:[#allocation8 + $0x10] sm:$0xff] }
 0x3e7   :  { %1167 = vmatpush3.bf16.msra.mxu0 %v1160_v5  ;;  %1081 = vmatprep.mubr.msk.f32.mxu0 %vm1338_vm0, %v1339_v1 }
 0x3e8   :  { %1168 = vmatprep.subr.bf16.mxu0 %v1337_v0 }
 0x3eb   :  { %1170 = vmatpush3.bf16.msra.mxu0 %v1163_v8 }
 0x3ec   :  { %1177 = vmatprep.subr.bf16.mxu0 %v1337_v0 }
 0x4b9   :  { %v509_v18 = vpop.f32.mrb[4].mxu0 }
 0x4ba   :  { %v513_v19 = vmul.f32 0.03125, %v509_v18  ;;  %v1072_v20 = vpop.f32.mrb[5].mxu0  ;;  %v810_v18 = vld [vmem:[#allocation8 + $0x18] sm:$0xff] }
 0x4bc   :  { %v517_v21 = vrot.slane %v513_v19, %v1523_v32  ;;  %v1187_v19 = vpack.c.bf16 %v810_v18, %v809_v17 }
 0x4be   :  { %v518_v22 = vsub.f32 %v425_v9, %v517_v21 }
 0x4c0   :  { %v519_v23 = vmul.f32 %v518_v22, %v518_v22 }
 0x4c2   :  { %v520_v24 = vsel %vm90_vm1, %v519_v23, 0.0 }
 0x4c3   :  { %v521_v25 = vrot.slane %v520_v24, 4 }
 0x4c5   :  { %v522_v26 = vadd.f32 %v521_v25, %v520_v24 }
 0x4c7   :  { %v523_v27 = vrot.slane %v522_v26, 2 }
 0x4c9   :  { %v524_v28 = vadd.f32 %v523_v27, %v522_v26 }
 0x4cb   :  { %v525_v29 = vrot.slane %v524_v28, 1 }
 0x4cd   :  { %v526_v31 = vadd.f32 %v525_v29, %v524_v28 }
 0x4cf   :  { %1082 = vmatmul.mubr.msk.f32.vlgmr.msra.gmra.mrb[6].mxu0 %vm90_vm1, %v526_v31 }
 0x4d0   :  { %1103 = vmatprep.mubr.msk.f32.mxu0 %vm1338_vm0, %v1339_v1  ;;  %1179 = vmatpush3.bf16.msra.mxu0 %v1178_v51 }
 0x4d1   :  { %1180 = vmatprep.subr.bf16.mxu0 %v1337_v0 }
 0x5a2   :  { %v596_v39 = vpop.f32.mrb[6].mxu0 }
 0x5a3   :  { %v600_v40 = vmul.f32 0.032258064, %v596_v39  ;;  %v1083_v41 = vpop.f32.mrb[7].mxu0 }
 0x5a5   :  { %1201 = vrsqrt.f32 %v600_v40 }
 0x5af   :  { %v1202_v42 = vpop.eup %1201 }
 0x5b0   :  { %v605_v43 = vrot.slane %v1202_v42, %v1523_v32  ;;  %v1181_v32 = vpack.c.bf16 %v712_v53, %v711_v52 }
 0x5b2   :  { %v606_v44 = vmul.f32 %v605_v43, %v518_v22  ;;  %1182 = vmatpush3.bf16.msra.mxu0 %v1181_v32 }
 0x5b4   :  { %v607_v45 = vmul.f32 0.5, %v606_v44 }
 0x5b6   :  { %1203 = vtanh.f32 %v607_v45 }
 0x5c0   :  { %v1204_v46 = vpop.eup %1203 }
 0x5c1   :  { %v609_v47 = vmul.f32 0.5, %v1204_v46 }
 0x5c3   :  { %v610_v48 = vadd.f32 0.5, %v609_v47 }
 0x5c5   :  { %1093 = vmatmul.mubr.msk.f32.vlgmr.msra.gmra.mrb[4].mxu1 %vm90_vm1, %v610_v48 }
 0x5c6   :  { %1114 = vmatprep.mubr.msk.f32.mxu1 %vm1338_vm0, %v1339_v1  ;;  %1185 = vmatpush3.bf16.msra.mxu1 %v1184_v16 }
 0x5c7   :  { %1186 = vmatprep.subr.bf16.mxu1 %v1337_v0 }
 0x5ca   :  { %1188 = vmatpush3.bf16.msra.mxu1 %v1187_v19 }
 0x698   :  { %v684_v54 = vpop.f32.mrb[4].mxu1 }
 0x699   :  { %v688_v55 = vsel %vm90_vm1, %v684_v54, 0.0  ;;  %v1094_v56 = vpop.f32.mrb[5].mxu1 }
 0x69a   :  { %v689_v57 = vrot.slane %v688_v55, 4 }
 0x69c   :  { %v690_v58 = vadd.f32 %v689_v57, %v688_v55 }
 0x69e   :  { %v691_v59 = vrot.slane %v690_v58, 2 }
 0x6a0   :  { %v692_v60 = vadd.f32 %v691_v59, %v690_v58  ;;  %v901_v58 = vand.u32 127, %v254_v30 }
 0x6a2   :  { %v693_v61 = vrot.slane %v692_v60, 1  ;;  %vm902_vm3 = vcmp.lt.s32.totalorder %v901_v58, 1 }
 0x6a4   :  { %v694_v1 = vadd.f32 %v693_v61, %v692_v60 }
 0x6a6   :  { %v695_v62 = vmul.f32 0.125, %v694_v1 }
 0x6a8   :  { %v696_v63 = vsub.f32 %v684_v54, %v695_v62 }
 0x6aa   :  { %v697_v2 = vmul.f32 %v696_v63, %v696_v63 }
 0x6ac   :  { %v698_v3 = vsel %vm90_vm1, %v697_v2, 0.0 }
 0x6ad   :  { %v699_v4 = vrot.slane %v698_v3, 4 }
 0x6af   :  { %v700_v5 = vadd.f32 %v699_v4, %v698_v3 }
 0x6b1   :  { %v701_v6 = vrot.slane %v700_v5, 2 }
 0x6b3   :  { %v702_v7 = vadd.f32 %v701_v6, %v700_v5 }
 0x6b5   :  { %v703_v8 = vrot.slane %v702_v7, 1 }
 0x6b7   :  { %v704_v9 = vadd.f32 %v703_v8, %v702_v7 }
 0x6b9   :  { %v705_v10 = vmul.f32 0.14285715, %v704_v9 }
 0x6bb   :  { %1205 = vrsqrt.f32 %v705_v10 }
 0x6c5   :  { %v1206_v11 = vpop.eup %1205 }
 0x6c6   :  { %v707_v12 = vmul.f32 %v1206_v11, %v696_v63 }
 0x6c8   :  { %v708_v13 = vmax.f32 %v707_v12, 0.0 }
 0x6ca   :  { %1104 = vmatmul.mubr.msk.f32.vlgmr.msra.gmra.mrb[8].mxu0 %vm90_vm1, %v708_v13 }
 0x79d   :  { %v782_v20 = vpop.f32.mrb[8].mxu0 }
 0x79e   :  { %v786_v21 = vsel %vm90_vm1, %v782_v20, 0.0  ;;  %v1105_v22 = vpop.f32.mrb[9].mxu0 }
 0x79f   :  { %v787_v23 = vrot.slane %v786_v21, 4 }
 0x7a1   :  { %v788_v24 = vadd.f32 %v787_v23, %v786_v21 }
 0x7a3   :  { %v789_v25 = vrot.slane %v788_v24, 2 }
 0x7a5   :  { %v790_v26 = vadd.f32 %v789_v25, %v788_v24 }
 0x7a7   :  { %v791_v27 = vrot.slane %v790_v26, 1 }
 0x7a9   :  { %v792_v28 = vadd.f32 %v791_v27, %v790_v26 }
 0x7ab   :  { %v793_v29 = vmul.f32 0.125, %v792_v28 }
 0x7ad   :  { %v794_v31 = vsub.f32 %v782_v20, %v793_v29 }
 0x7af   :  { %v795_v33 = vmul.f32 %v794_v31, %v794_v31 }
 0x7b1   :  { %v796_v34 = vsel %vm90_vm1, %v795_v33, 0.0 }
 0x7b2   :  { %v797_v0 = vrot.slane %v796_v34, 4 }
 0x7b4   :  { %v798_v35 = vadd.f32 %v797_v0, %v796_v34 }
 0x7b6   :  { %v799_v36 = vrot.slane %v798_v35, 2 }
 0x7b8   :  { %v800_v37 = vadd.f32 %v799_v36, %v798_v35 }
 0x7ba   :  { %v801_v38 = vrot.slane %v800_v37, 1 }
 0x7bc   :  { %v802_v39 = vadd.f32 %v801_v38, %v800_v37 }
 0x7be   :  { %v803_v40 = vmul.f32 0.14285715, %v802_v39 }
 0x7c0   :  { %1207 = vrsqrt.f32 %v803_v40 }
 0x7ca   :  { %v1208_v41 = vpop.eup %1207 }
 0x7cb   :  { %v805_v42 = vmul.f32 %v1208_v41, %v794_v31 }
 0x7cd   :  { %v806_v43 = vmax.f32 %v805_v42, 0.0 }
 0x7cf   :  { %1115 = vmatmul.mubr.msk.f32.vlgmr.msra.gmra.mrb[6].mxu1 %vm90_vm1, %v806_v43 }
 0x8a2   :  { %v880_v44 = vpop.f32.mrb[6].mxu1 }
 0x8a3   :  { %v884_v45 = vrot.slane %v880_v44, 4  ;;  %v1116_v46 = vpop.f32.mrb[7].mxu1 }
 0x8a5   :  { %v885_v47 = vadd.f32 %v884_v45, %v880_v44 }
 0x8a7   :  { %v886_v48 = vrot.slane %v885_v47, 2 }
 0x8a9   :  { %v887_v49 = vadd.f32 %v886_v48, %v885_v47 }
 0x8ab   :  { %v888_v50 = vrot.slane %v887_v49, 1 }
 0x8ad   :  { %v889_v51 = vadd.f32 %v888_v50, %v887_v49 }
 0x8af   :  { %v890_v52 = vmul.f32 0.125, %v889_v51 }
 0x8b1   :  { %v891_v53 = vsub.f32 %v880_v44, %v890_v52 }
 0x8b3   :  { %v892_v32 = vmul.f32 %v891_v53, %v891_v53 }
 0x8b5   :  { %v893_v54 = vrot.slane %v892_v32, 4 }
 0x8b7   :  { %v894_v55 = vadd.f32 %v893_v54, %v892_v32 }
 0x8b9   :  { %v895_v56 = vrot.slane %v894_v55, 2 }
 0x8bb   :  { %v896_v57 = vadd.f32 %v895_v56, %v894_v55 }
 0x8bd   :  { %v897_v59 = vrot.slane %v896_v57, 1 }
 0x8bf   :  { %v898_v60 = vadd.f32 %v897_v59, %v896_v57 }
 0x8c1   :  { %v899_v61 = vmul.f32 0.14285715, %v898_v60 }
 0x8c3   :  { %v903_v1 = vsel %vm902_vm3, %v899_v61, 1.0 }
 0x8c4   :  { %1209 = vrsqrt.f32 %v903_v1 }
 0x8ce   :  { %v1210_v62 = vpop.eup %1209 }
 0x8cf   :  { %v905_v63 = vmul.f32 %v1210_v62, %v891_v53 }
 0x8d1   :  { %v906_v2 = vmul.f32 0.5, %v905_v63 }
 0x8d3   :  { %1211 = vtanh.f32 %v906_v2 }
 0x8dd   :  { %v1212_v3 = vpop.eup %1211 }
 0x8de   :  { %v908_v4 = vmul.f32 0.5, %v1212_v3 }
 0x8e0   :  { %v909_v5 = vadd.f32 0.5, %v908_v4 }
 0x8e2   :  { %910 = vst [vmem:[#allocation10] sm:$0xff] %v909_v5 }
 0x8e3   :  { %1312 = shalt.err (!%p1309_p8)
}
 0x8e4   :  { %s1313_s23 = scalar_lea.hbm %s1610_s8, 128 }
 0x8e5   :  { %p1314_p9 = scmp.ne.s32.totalorder %s1610_s8, %s1313_s23  ;;  %p1317_p10 = scmp.lt.u32.totalorder %s1313_s23, %s1610_s8 }
 0x8e7   :  { %p1319_p11 = pnand %p1317_p10, %p1314_p9 }
 0x8e9   :  { %1322 = shalt.err (!%p1319_p11)
}
 0x8ea   :  { %920 = dma.vmem_to_hbm [thread:$0]  %s918_s4, 128, %s1610_s8, [#allocation4]  }
 0x8eb   :  { %1329 = dma.done.wait [#allocation4], 128  }
 0x8ec   :  { %1330 = vsyncadd [#allocation4], 4294967168 }
 0x8ed   :  { %924 = vsyncpa [#allocation3], 1 }
 0x8ee   :  { %925 = vsyncpa [#allocation6], 1 }
 0x8ef   :  { %926 = vsyncpa [#allocation9], 1 }
 0x8f0   :  { %927 = vsyncpa [#allocation4], 1 }

</bundles_post_ra>
